<compile_context>
chip_gen: v5e
topology: v5e:2x2
jax: 0.10.0
libtpu: 0.0.40
codegen_flags: <defaults>
</compile_context>

<pallas_src>
import jax
import jax.numpy as jnp
from jax.experimental import pallas as pl
from jax.experimental.pallas import tpu as pltpu

# Synthetic "env" constants (the original module pulls these from `env`).
STATE_DIM = 8
ACTION_DIM = 4
MAX_ACTION = 2.0

H1 = 256                 # fc1 width
H2 = 128                 # fc2 width
OUT_PAD = 128            # lane-dense padded fc3 output width (>= ACTION_DIM)
AUG = 16                 # augmented state width: STATE_DIM + ones col, padded to 16

# Packed parameter slab layout (bf16, 256 lanes).  All sub-blocks start on
# 16-row / 128-lane boundaries (bf16 native (16, 128) tiles) so the static
# in-kernel slices are tile-aligned (no hidden VMEM copies).
SLAB_LANES = 256
ROW_W1 = 0                     # rows [0, 16):   W1 augmented (rows 0..7 = W1, row 8 = b1)
ROW_W2 = ROW_W1 + AUG          # rows [16, 272): W2 (256, 128), lanes 128:256 zero
ROW_B2 = ROW_W2 + H1           # row  272:       b2 (lanes 0:128)
ROW_W3 = ROW_B2 + 16           # rows [288, 416): W3 padded (128, OUT_PAD), lanes 0:128
ROW_B3 = ROW_W3 + H2           # row  416:       b3 (lanes 0:OUT_PAD)
SLAB_ROWS = ROW_B3 + 16        # 432

TB_MAX = 1024                  # max batch tile (per-grid-step overhead amortization)


def _cdiv(a, b):
    return -(-a // b)


def _round_up(x, m):
    return _cdiv(x, m) * m


def _choose_tile(B):
    """Pick (batch_tile, padded_batch).

    * tiles are multiples of 8 rows (full f32 sublanes)
    * tiles capped at TB_MAX; balanced so B just above a multiple of TB_MAX
      does not double the padded batch
    * whenever there is more than one tile of work, use an even number of
      (>= 2) grid steps so a v7x megacore can split the batch across its two
      TensorCores; near-zero cost on v5e/v6e (single TC).
    """
    B8 = max(8, _round_up(B, 8))
    if B8 <= 8:
        return 8, 8
    n = max(_cdiv(B8, TB_MAX), 2)
    if n % 2:
        n += 1
    tb = _round_up(_cdiv(B8, n), 8)
    return tb, tb * n


def actor_kernel(state_ref, w_ref, out_ref):
    # state_ref: (TB, AUG) f32 -- cols 0..7 = state, col 8 = 1.0, rest 0.
    # w_ref:     (SLAB_ROWS, SLAB_LANES) bf16 packed params (VMEM-resident).
    x = state_ref[...].astype(jnp.bfloat16)

    # Layer 1: bias folded into the matmul via the augmented ones column.
    # (TB, 16) @ (16, 256) -> f32 acc -> relu
    h = jnp.dot(x, w_ref[ROW_W1:ROW_W1 + AUG, :],
                preferred_element_type=jnp.float32)
    h = jnp.maximum(h, 0.0)

    # Layer 2: (TB, 256) @ (256, 256 lane-padded) + b2 -> relu
    # (lanes 128:256 of W2/b2 are zero; they are sliced away before layer 3).
    b2 = w_ref[ROW_B2:ROW_B2 + 1, :].astype(jnp.float32)
    h = jnp.dot(h.astype(jnp.bfloat16), w_ref[ROW_W2:ROW_W2 + H1, :],
                preferred_element_type=jnp.float32) + b2
    h = jnp.maximum(h, 0.0)

    # Layer 3 (output padded to 128 lanes): (TB, 128) @ (128, 128) + b3
    b3 = w_ref[ROW_B3:ROW_B3 + 1, 0:OUT_PAD].astype(jnp.float32)
    h3 = jnp.dot(h[:, 0:H2].astype(jnp.bfloat16),
                 w_ref[ROW_W3:ROW_W3 + H2, 0:OUT_PAD],
                 preferred_element_type=jnp.float32) + b3

    # MAX_ACTION * tanh (f32 EUP) -> lane-dense bf16 store; columns >=
    # ACTION_DIM are junk and are sliced off in the wrapper.
    out_ref[...] = (MAX_ACTION * jnp.tanh(h3)).astype(out_ref.dtype)


def actor_forward(state, slab):
    """Fused actor forward pass. state: (B, STATE_DIM) float32."""
    assert state.shape[1] == STATE_DIM
    B = state.shape[0]
    TB, B_pad = _choose_tile(B)
    grid = (B_pad // TB,)

    # Augmented state: cols [0:STATE_DIM] = state, col STATE_DIM = 1.0 (the
    # bias lane that rides the fc1 matmul), remaining cols / pad rows = 0.
    x_aug = jnp.zeros((B_pad, AUG), jnp.float32)
    x_aug = x_aug.at[:B, :STATE_DIM].set(state)
    x_aug = x_aug.at[:, STATE_DIM].set(1.0)

    flops = 2 * B_pad * (AUG * H1 + H1 * SLAB_LANES + H2 * OUT_PAD)
    bytes_accessed = (x_aug.size * 4            # augmented state in (f32)
                      + B_pad * OUT_PAD * 2     # bf16 padded output
                      + SLAB_ROWS * SLAB_LANES * 2)   # bf16 param slab
    cost = pl.CostEstimate(flops=flops,
                           transcendentals=B_pad * OUT_PAD,
                           bytes_accessed=bytes_accessed)

    out = pl.pallas_call(
        actor_kernel,
        out_shape=jax.ShapeDtypeStruct((B_pad, OUT_PAD), jnp.bfloat16),
        grid=grid,
        in_specs=[
            # Batch tile of the augmented state.
            pl.BlockSpec((TB, AUG), lambda i: (i, 0)),
            # Packed params: constant index_map -> DMA'd once, VMEM-resident
            # across all batch tiles.
            pl.BlockSpec((SLAB_ROWS, SLAB_LANES), lambda i: (0, 0)),
        ],
        out_specs=pl.BlockSpec((TB, OUT_PAD), lambda i: (i, 0)),
        compiler_params=pltpu.CompilerParams(
            dimension_semantics=("parallel",),
            vmem_limit_bytes=32 * 1024 * 1024),
        cost_estimate=cost,
    )(x_aug, slab)

    return out[:B, :ACTION_DIM].astype(jnp.float32)


def pack_params(w1, b1, w2, b2, w3, b3):
    """Pack f32 (in, out) weights + biases into the bf16 parameter slab."""
    slab = jnp.zeros((SLAB_ROWS, SLAB_LANES), jnp.float32)
    # Layer 1 augmented block: rows 0..7 = W1, row STATE_DIM = b1.
    slab = slab.at[ROW_W1:ROW_W1 + STATE_DIM, 0:H1].set(w1)
    slab = slab.at[ROW_W1 + STATE_DIM, 0:H1].set(b1)
    # Layer 2.
    slab = slab.at[ROW_W2:ROW_W2 + H1, 0:H2].set(w2)
    slab = slab.at[ROW_B2, 0:H2].set(b2)
    # Layer 3 (output lanes zero-padded to OUT_PAD).
    slab = slab.at[ROW_W3:ROW_W3 + H2, 0:ACTION_DIM].set(w3)
    slab = slab.at[ROW_B3, 0:ACTION_DIM].set(b3)
    return slab.astype(jnp.bfloat16)


def init_params(key):
    """Init mimicking nn.Linear default U(-1/sqrt(fan_in), +1/sqrt(fan_in))."""
    def linear(key, fan_in, fan_out):
        kw, kb = jax.random.split(key)
        bound = 1.0 / jnp.sqrt(jnp.float32(fan_in))
        w = jax.random.uniform(kw, (fan_in, fan_out), jnp.float32, -bound, bound)
        b = jax.random.uniform(kb, (fan_out,), jnp.float32, -bound, bound)
        return w, b

    k1, k2, k3 = jax.random.split(key, 3)
    w1, b1 = linear(k1, STATE_DIM, H1)
    w2, b2 = linear(k2, H1, H2)
    w3, b3 = linear(k3, H2, ACTION_DIM)
    return pack_params(w1, b1, w2, b2, w3, b3)


def reference_forward(state, slab):
    """Pure-JAX reference with identical packed params and dtype flow
    (bf16 MXU inputs, f32 accumulation/elementwise, bf16 final store)."""
    B = state.shape[0]
    x_aug = jnp.zeros((B, AUG), jnp.float32)
    x_aug = x_aug.at[:, :STATE_DIM].set(state).at[:, STATE_DIM].set(1.0)

    w1 = slab[ROW_W1:ROW_W1 + AUG, :]
    w2 = slab[ROW_W2:ROW_W2 + H1, :]
    b2 = slab[ROW_B2:ROW_B2 + 1, :].astype(jnp.float32)
    w3 = slab[ROW_W3:ROW_W3 + H2, 0:OUT_PAD]
    b3 = slab[ROW_B3:ROW_B3 + 1, 0:OUT_PAD].astype(jnp.float32)

    h = jnp.maximum(jnp.dot(x_aug.astype(jnp.bfloat16), w1,
                            preferred_element_type=jnp.float32), 0.0)
    h = jnp.maximum(jnp.dot(h.astype(jnp.bfloat16), w2,
                            preferred_element_type=jnp.float32) + b2, 0.0)
    h3 = jnp.dot(h[:, 0:H2].astype(jnp.bfloat16), w3,
                 preferred_element_type=jnp.float32) + b3
    out = (MAX_ACTION * jnp.tanh(h3)).astype(jnp.bfloat16)
    return out[:, :ACTION_DIM].astype(jnp.float32)


if __name__ == "__main__":
    key = jax.random.PRNGKey(0)
    k_params, k_state1, k_state2 = jax.random.split(key, 3)

    slab = init_params(k_params)

    # Tiny per-RL-step batch (single grid step).
    batch = 2
    state = jax.random.normal(k_state1, (batch, STATE_DIM), jnp.float32)
    out = jax.block_until_ready(actor_forward(state, slab))
    ref = jax.block_until_ready(reference_forward(state, slab))
    assert out.shape == (batch, ACTION_DIM)
    assert jnp.allclose(out, ref, atol=1e-2, rtol=1e-2), (out, ref)

    # Small multi-tile batch (exercises the 2-step "parallel" grid path and
    # batch padding / slicing).
    batch2 = 12
    state2 = jax.random.normal(k_state2, (batch2, STATE_DIM), jnp.float32)
    out2 = jax.block_until_ready(actor_forward(state2, slab))
    ref2 = jax.block_until_ready(reference_forward(state2, slab))
    assert out2.shape == (batch2, ACTION_DIM)
    assert jnp.allclose(out2, ref2, atol=1e-2, rtol=1e-2), (out2, ref2)

    print("KERNEL_OK")
</pallas_src>

<mosaic_0001>
module attributes {stable_mosaic.version = 11 : i64} {
  func.func @actor_kernel(%arg0: i32, %arg1: memref<8x16xf32, #tpu.memory_space<vmem>>, %arg2: memref<432x256xbf16, #tpu.memory_space<vmem>>, %arg3: memref<8x128xbf16, #tpu.memory_space<vmem>>) attributes {dimension_semantics = [#tpu.dimension_semantics<parallel>], iteration_bounds = array<i64: 1>, scalar_prefetch = 0 : i64, scratch_operands = 0 : i64, tpu.core_type = #tpu.core_type<tc>, window_params = [{transform_indices = @transform_0, window_bounds = array<i64: 8, 16>}, {pipeline_mode = #tpu.pipeline_mode<synchronous>, transform_indices = @transform_1, window_bounds = array<i64: 432, 256>}, {transform_indices = @transform_2, window_bounds = array<i64: 8, 128>}]} {
    %c0 = arith.constant 0 : index
    %c0_0 = arith.constant 0 : index
    %0 = vector.load %arg1[%c0, %c0_0] : memref<8x16xf32, #tpu.memory_space<vmem>>, vector<8x16xf32>
    %1 = arith.truncf %0 : vector<8x16xf32> to vector<8x16xbf16>
    %c0_1 = arith.constant 0 : index
    %c0_2 = arith.constant 0 : index
    %2 = vector.load %arg2[%c0_1, %c0_2] : memref<432x256xbf16, #tpu.memory_space<vmem>>, vector<16x256xbf16>
    %cst = arith.constant dense<0.000000e+00> : vector<8x256xf32>
    %3 = tpu.matmul %1, %2, %cst {dimension_numbers = #tpu.dot_dimension_numbers<[1], [0], [0], [1], [0, 0, 1, 1], [], []>} : vector<8x16xbf16>, vector<16x256xbf16>, vector<8x256xf32> -> vector<8x256xf32>
    %cst_3 = arith.constant 0.000000e+00 : f32
    %4 = vector.broadcast %cst_3 : f32 to vector<8x256xf32>
    %5 = arith.maximumf %3, %4 : vector<8x256xf32>
    %c272 = arith.constant 272 : index
    %c0_4 = arith.constant 0 : index
    %6 = vector.load %arg2[%c272, %c0_4] : memref<432x256xbf16, #tpu.memory_space<vmem>>, vector<1x256xbf16>
    %7 = arith.extf %6 : vector<1x256xbf16> to vector<1x256xf32>
    %8 = arith.truncf %5 : vector<8x256xf32> to vector<8x256xbf16>
    %c16 = arith.constant 16 : index
    %c0_5 = arith.constant 0 : index
    %9 = vector.load %arg2[%c16, %c0_5] : memref<432x256xbf16, #tpu.memory_space<vmem>>, vector<256x256xbf16>
    %cst_6 = arith.constant dense<0.000000e+00> : vector<8x256xf32>
    %10 = tpu.matmul %8, %9, %cst_6 {dimension_numbers = #tpu.dot_dimension_numbers<[1], [0], [0], [1], [0, 0, 1, 1], [], []>} : vector<8x256xbf16>, vector<256x256xbf16>, vector<8x256xf32> -> vector<8x256xf32>
    %11 = vector.broadcast %7 : vector<1x256xf32> to vector<8x256xf32>
    %12 = arith.addf %10, %11 : vector<8x256xf32>
    %cst_7 = arith.constant 0.000000e+00 : f32
    %13 = vector.broadcast %cst_7 : f32 to vector<8x256xf32>
    %14 = arith.maximumf %12, %13 : vector<8x256xf32>
    %c416 = arith.constant 416 : index
    %c0_8 = arith.constant 0 : index
    %15 = vector.load %arg2[%c416, %c0_8] : memref<432x256xbf16, #tpu.memory_space<vmem>>, vector<1x128xbf16>
    %16 = arith.extf %15 : vector<1x128xbf16> to vector<1x128xf32>
    %17 = vector.extract_strided_slice %14 {offsets = [0, 0], sizes = [8, 128], strides = [1, 1]} : vector<8x256xf32> to vector<8x128xf32>
    %18 = arith.truncf %17 : vector<8x128xf32> to vector<8x128xbf16>
    %c288 = arith.constant 288 : index
    %c0_9 = arith.constant 0 : index
    %19 = vector.load %arg2[%c288, %c0_9] : memref<432x256xbf16, #tpu.memory_space<vmem>>, vector<128x128xbf16>
    %cst_10 = arith.constant dense<0.000000e+00> : vector<8x128xf32>
    %20 = tpu.matmul %18, %19, %cst_10 {dimension_numbers = #tpu.dot_dimension_numbers<[1], [0], [0], [1], [0, 0, 1, 1], [], []>} : vector<8x128xbf16>, vector<128x128xbf16>, vector<8x128xf32> -> vector<8x128xf32>
    %21 = vector.broadcast %16 : vector<1x128xf32> to vector<8x128xf32>
    %22 = arith.addf %20, %21 : vector<8x128xf32>
    %23 = math.tanh %22 : vector<8x128xf32>
    %cst_11 = arith.constant 2.000000e+00 : f32
    %24 = vector.broadcast %cst_11 : f32 to vector<8x128xf32>
    %25 = arith.mulf %24, %23 : vector<8x128xf32>
    %26 = arith.truncf %25 : vector<8x128xf32> to vector<8x128xbf16>
    %c0_12 = arith.constant 0 : index
    %c0_13 = arith.constant 0 : index
    %27 = vector.load %arg3[%c0_12, %c0_13] : memref<8x128xbf16, #tpu.memory_space<vmem>>, vector<8x128xbf16>
    tpu.vector_store %arg3[%c0_12, %c0_13], %26 {strides = array<i32>} : memref<8x128xbf16, #tpu.memory_space<vmem>>, vector<8x128xbf16>,
    return
  }
  func.func @transform_0(%arg0: i32) -> (i32, i32) {
    %c0_i32 = arith.constant 0 : i32
    %c0_i32_0 = arith.constant 0 : i32
    return %arg0, %c0_i32 : i32, i32
  }
  func.func @transform_1(%arg0: i32) -> (i32, i32) {
    %c0_i32 = arith.constant 0 : i32
    %c0_i32_0 = arith.constant 0 : i32
    %c0_i32_1 = arith.constant 0 : i32
    return %c0_i32, %c0_i32_0 : i32, i32
  }
  func.func @transform_2(%arg0: i32) -> (i32, i32) {
    %c0_i32 = arith.constant 0 : i32
    %c0_i32_0 = arith.constant 0 : i32
    return %arg0, %c0_i32 : i32, i32
  }
}

</mosaic_0001>

<bundles_post_ra>
// kernel: tpu_custom_call.1
= control target key start
LH: loop header
LB: loop body
LE: loop exit
PB: predicated region body
PF: predicated region fallthrough
CT: control target
= control target key end

     0   :  { %7 = vsyncpa [#allocation3], 0  ;;  %s600_s0 = inlined_call_operand.hbm [shape: f32[8,16], index: 0, kind: input, shape index: {}]   ;;  %s601_s1 = inlined_call_operand.hbm [shape: bf16[432,256], index: 1, kind: input, shape index: {}]   ;;  %s602_s2 = inlined_call_operand.hbm [shape: bf16[8,128], index: 2, kind: output, shape index: {}]  }
   0x1   :  { %8 = vsyncpa [#allocation6], 0 }
   0x2   :  { %9 = vsyncpa [#allocation4], 0  ;;  %s15_s11 = sshll.u32 %s600_s0, 4  ;;  %s569_s12 = smov [#allocation2]   ;;  %s16_s11 = int_to_ptr.hbm [resolvable:$true] %s15_s11 }
   0x3   :  { %s17_s13 = sshll.u32 %s569_s12, 4  ;;  %s25_s16 = sshll.u32 %s601_s1, 4  ;;  %s18_s13 = int_to_ptr.vmem [resolvable:$true] %s17_s13  ;;  %s26_s16 = int_to_ptr.hbm [resolvable:$true] %s25_s16 }
   0x4   :  { %20 = dma.hbm_to_vmem [thread:$0]  %s16_s11, 128, %s18_s13, [#allocation3]  }
   0x5   :  { %s570_s17 = smov [#allocation5]   ;;  %s571_s19 = smov 128  }
   0x6   :  { %s27_s18 = sshll.u32 %s570_s17, 4  ;;  %s572_s20 = smov 8   ;;  %s28_s18 = int_to_ptr.vmem [resolvable:$true] %s27_s18 }
   0x7   :  { %33 = dma.hbm_to_vmem [thread:$0]  %s26_s16, 6912, %s28_s18, [#allocation6], %s571_s19, %s571_s19, %s572_s20  }
   0x8   :  { %563 = dma.done.wait [#allocation3], 128  }
   0x9   :  { %564 = vsyncadd [#allocation3], 4294967168 }
   0xa   :  { %565 = dma.done.wait [#allocation6], 6912  }
   0xb   :  { %566 = vsyncadd [#allocation6], 4294960384  ;;  %v354_v0 = vld [vmem:[#allocation5] sm:$0xf]  ;;  %v459_v1 = vld [vmem:[#allocation5 + $0x4] sm:$0xf0] }
   0xc   :  { %v43_v2 = vld [vmem:[#allocation2] sm:$0xff]  ;;  %v355_v3 = vor.u32 %v459_v1, %v354_v0  ;;  %v458_v4 = vld [vmem:[#allocation5 + $0x4] sm:$0xf]  ;;  %v356_v5 = vld [vmem:[#allocation5 + $0x8] sm:$0xf0]  ;;  %vm57_vm0 = vcmask 130048  }
   0xd   :  { %v392_v6 = vld [vmem:[#allocation5 + $0x80] sm:$0xf]  ;;  %v44_v7 = vpack.c.bf16 %v43_v2, %v43_v2  ;;  %v359_v8 = vor.u32 %v458_v4, %v356_v5  ;;  %v467_v9 = vld [vmem:[#allocation5 + $0x84] sm:$0xf0]  ;;  %v388_v10 = vld [vmem:[#allocation5 + $0x70] sm:$0xf] }
   0xe   :  { %v466_v11 = vld [vmem:[#allocation5 + $0x74] sm:$0xf0]  ;;  %68 = vmatpush.bf16.msra.mxu1 %v355_v3  ;;  %v393_v12 = vor.u32 %v467_v9, %v392_v6  ;;  %v384_v14 = vld [vmem:[#allocation5 + $0x60] sm:$0xf]  ;;  %v475_v16 = vld [vmem:[#allocation5 + $0x104] sm:$0xf0] }
   0xf   :  { %v389_v13 = vor.u32 %v466_v11, %v388_v10  ;;  %v424_v15 = vld [vmem:[#allocation5 + $0x100] sm:$0xf]  ;;  %v465_v17 = vld [vmem:[#allocation5 + $0x64] sm:$0xf0]  ;;  %v420_v19 = vld [vmem:[#allocation5 + $0xf0] sm:$0xf] }
  0x10   :  { %222 = vmatpush.bf16.msra.mxu2 %v393_v12  ;;  %v425_v18 = vor.u32 %v475_v16, %v424_v15  ;;  %v474_v20 = vld [vmem:[#allocation5 + $0xf4] sm:$0xf0]  ;;  %v385_v22 = vor.u32 %v465_v17, %v384_v14  ;;  %v416_v23 = vld [vmem:[#allocation5 + $0xe0] sm:$0xf]  ;;  %v473_v24 = vld [vmem:[#allocation5 + $0xe4] sm:$0xf0] }
  0x11   :  { %360 = vmatmul.msk.bf16.vlgmr.msra.gmra.mxu1 %vm57_vm0, %v44_v7  ;;  %v421_v21 = vor.u32 %v474_v20, %v420_v19  ;;  %v380_v25 = vld [vmem:[#allocation5 + $0x50] sm:$0xf]  ;;  %v464_v26 = vld [vmem:[#allocation5 + $0x54] sm:$0xf0]  ;;  %v417_v27 = vor.u32 %v473_v24, %v416_v23  ;;  %v376_v29 = vld [vmem:[#allocation5 + $0x40] sm:$0xf] }
  0x12   :  { %81 = vmatpush.bf16.msrb.mxu1 %v359_v8  ;;  %235 = vmatpush.bf16.msra.mxu3 %v425_v18  ;;  %v381_v28 = vor.u32 %v464_v26, %v380_v25  ;;  %v463_v30 = vld [vmem:[#allocation5 + $0x44] sm:$0xf0]  ;;  %v372_v32 = vld [vmem:[#allocation5 + $0x30] sm:$0xf]  ;;  %v462_v33 = vld [vmem:[#allocation5 + $0x34] sm:$0xf0] }
  0x13   :  { %v377_v31 = vor.u32 %v463_v30, %v376_v29  ;;  %v373_v34 = vor.u32 %v462_v33, %v372_v32  ;;  %v368_v35 = vld [vmem:[#allocation5 + $0x20] sm:$0xf]  ;;  %v461_v36 = vld [vmem:[#allocation5 + $0x24] sm:$0xf0]  ;;  %v364_v38 = vld [vmem:[#allocation5 + $0x10] sm:$0xf] }
  0x14   :  { %223 = vmatpush.bf16.msra.mxu2 %v389_v13  ;;  %v369_v37 = vor.u32 %v461_v36, %v368_v35  ;;  %v460_v39 = vld [vmem:[#allocation5 + $0x14] sm:$0xf0]  ;;  %v412_v40 = vld [vmem:[#allocation5 + $0xd0] sm:$0xf]  ;;  %v408_v44 = vld [vmem:[#allocation5 + $0xc0] sm:$0xf] }
  0x15   :  { %v365_v41 = vor.u32 %v460_v39, %v364_v38  ;;  %v472_v42 = vld [vmem:[#allocation5 + $0xd4] sm:$0xf0]  ;;  %v471_v45 = vld [vmem:[#allocation5 + $0xc4] sm:$0xf0]  ;;  %v404_v47 = vld [vmem:[#allocation5 + $0xb0] sm:$0xf] }
  0x16   :  { %236 = vmatpush.bf16.msra.mxu3 %v421_v21  ;;  %v413_v43 = vor.u32 %v472_v42, %v412_v40  ;;  %v409_v46 = vor.u32 %v471_v45, %v408_v44  ;;  %v470_v48 = vld [vmem:[#allocation5 + $0xb4] sm:$0xf0]  ;;  %v400_v50 = vld [vmem:[#allocation5 + $0xa0] sm:$0xf]  ;;  %v469_v51 = vld [vmem:[#allocation5 + $0xa4] sm:$0xf0] }
  0x17   :  { %v405_v49 = vor.u32 %v470_v48, %v404_v47  ;;  %v401_v52 = vor.u32 %v469_v51, %v400_v50  ;;  %v396_v53 = vld [vmem:[#allocation5 + $0x90] sm:$0xf]  ;;  %v468_v54 = vld [vmem:[#allocation5 + $0x94] sm:$0xf0]  ;;  %v452_v58 = vld [vmem:[#allocation5 + $0x180] sm:$0xf] }
  0x18   :  { %224 = vmatpush.bf16.msra.mxu2 %v385_v22  ;;  %v397_v55 = vor.u32 %v468_v54, %v396_v53  ;;  %v456_v56 = vld [vmem:[#allocation5 + $0x190] sm:$0xf]  ;;  %v483_v57 = vld [vmem:[#allocation5 + $0x194] sm:$0xf0]  ;;  %v482_v60 = vld [vmem:[#allocation5 + $0x184] sm:$0xf0] }
  0x19   :  { %v457_v59 = vor.u32 %v483_v57, %v456_v56  ;;  %v453_v61 = vor.u32 %v482_v60, %v452_v58  ;;  %v448_v6 = vld [vmem:[#allocation5 + $0x170] sm:$0xf]  ;;  %v444_v9 = vld [vmem:[#allocation5 + $0x160] sm:$0xf]  ;;  %v480_v10 = vld [vmem:[#allocation5 + $0x164] sm:$0xf0] }
  0x1a   :  { %237 = vmatpush.bf16.msra.mxu3 %v417_v27  ;;  %v445_v11 = vor.u32 %v480_v10, %v444_v9  ;;  %v440_v12 = vld [vmem:[#allocation5 + $0x150] sm:$0xf]  ;;  %v479_v13 = vld [vmem:[#allocation5 + $0x154] sm:$0xf0]  ;;  %v436_v15 = vld [vmem:[#allocation5 + $0x140] sm:$0xf] }
  0x1b   :  { %317 = vmatpush.bf16.msra.mxu0 %v457_v59  ;;  %v441_v14 = vor.u32 %v479_v13, %v440_v12  ;;  %v478_v16 = vld [vmem:[#allocation5 + $0x144] sm:$0xf0]  ;;  %v432_v18 = vld [vmem:[#allocation5 + $0x130] sm:$0xf]  ;;  %v477_v19 = vld [vmem:[#allocation5 + $0x134] sm:$0xf0] }
  0x1c   :  { %225 = vmatpush.bf16.msra.mxu2 %v381_v28  ;;  %v437_v17 = vor.u32 %v478_v16, %v436_v15  ;;  %v433_v20 = vor.u32 %v477_v19, %v432_v18  ;;  %v428_v21 = vld [vmem:[#allocation5 + $0x120] sm:$0xf]  ;;  %v476_v22 = vld [vmem:[#allocation5 + $0x124] sm:$0xf0]  ;;  %v89_v25 = vld [vmem:[#allocation5 + $0x110] sm:$0x1] }
  0x1d   :  { %v429_v23 = vor.u32 %v476_v22, %v428_v21  ;;  %v90_v26 = vunpack.c.l.bf16 %v89_v25  ;;  %v249_v35 = vld [vmem:[#allocation5 + $0x1a0] sm:$0x1]  ;;  %s573_s0 = smov [#allocation7]   ;;  %s341_s23 = sshll.u32 %s602_s2, 4  ;;  %s342_s23 = int_to_ptr.hbm [resolvable:$true] %s341_s23 }
  0x1e   :  { %238 = vmatpush.bf16.msra.mxu3 %v413_v43  ;;  %v250_v36 = vunpack.c.l.bf16 %v249_v35  ;;  %s339_s1 = sshll.u32 %s573_s0, 4  ;;  %s340_s1 = int_to_ptr.vmem [resolvable:$true] %s339_s1 }
  0x1f   :  { %318 = vmatpush.bf16.msra.mxu0 %v453_v61  ;;  %v125_v28 = vperm.slane %v90_v26, 0 }
  0x20   :  { %226 = vmatpush.bf16.msra.mxu2 %v377_v31 }
  0x21   :  { %361 = vmatmul.msk.bf16.vlgmr.msrb.gmra.mxu1 %vm57_vm0, %v44_v7  ;;  %v481_v7 = vld [vmem:[#allocation5 + $0x174] sm:$0xf0] }
  0x22   :  { %239 = vmatpush.bf16.msra.mxu3 %v409_v46  ;;  %v449_v8 = vor.u32 %v481_v7, %v448_v6 }
  0x24   :  { %227 = vmatpush.bf16.msra.mxu2 %v373_v34  ;;  %319 = vmatpush.bf16.msra.mxu0 %v449_v8 }
  0x26   :  { %240 = vmatpush.bf16.msra.mxu3 %v405_v49 }
  0x28   :  { %228 = vmatpush.bf16.msra.mxu2 %v369_v37  ;;  %320 = vmatpush.bf16.msra.mxu0 %v445_v11  ;;  %v268_v37 = vperm.slane %v250_v36, 0 }
  0x2a   :  { %241 = vmatpush.bf16.msra.mxu3 %v401_v52 }
  0x2c   :  { %229 = vmatpush.bf16.msra.mxu2 %v365_v41  ;;  %321 = vmatpush.bf16.msra.mxu0 %v441_v14 }
  0x2e   :  { %242 = vmatpush.bf16.msra.mxu3 %v397_v55 }
  0x30   :  { %322 = vmatpush.bf16.msra.mxu0 %v437_v17 }
  0x34   :  { %323 = vmatpush.bf16.msra.mxu0 %v433_v20 }
  0x38   :  { %324 = vmatpush.bf16.msra.mxu0 %v429_v23 }
  0x8e   :  { %v70_v62 = vpop.f32.mrf.mxu1 }
  0x8f   :  { %v87_v63 = vmax.f32 %v70_v62, 0.0 }
  0x91   :  { %v91_v0 = vpack.c.bf16 %v87_v63, %v87_v63 }
  0x93   :  { %230 = vmatmul.bf16.vlgmr.msra.gmra.mxu2 %v91_v0 }
  0x96   :  { %v72_v1 = vpop.f32.mrf.mxu1 }
  0x9e   :  { %v83_v2 = vpop.f32.mrf.mxu1 }
  0x9f   :  { %v88_v3 = vmax.f32 %v83_v2, 0.0 }
  0xa1   :  { %v92_v4 = vpack.c.bf16 %v88_v3, %v88_v3 }
  0xa3   :  { %243 = vmatmul.bf16.vlgmr.msra.gmra.mxu3 %v92_v4 }
  0xa6   :  { %v85_v5 = vpop.f32.mrf.mxu1 }
 0x116   :  { %v231_v24 = vpop.f32.mrf.mxu2 }
 0x117   :  { %v232_v29 = vadd.f32 %v231_v24, %v125_v28 }
 0x11e   :  { %v233_v27 = vpop.f32.mrf.mxu2 }
 0x126   :  { %v244_v30 = vpop.f32.mrf.mxu3 }
 0x127   :  { %v245_v31 = vadd.f32 %v244_v30, %v232_v29 }
 0x129   :  { %v248_v32 = vmax.f32 %v245_v31, 0.0 }
 0x12b   :  { %v251_v33 = vpack.c.bf16 %v248_v32, %v248_v32 }
 0x12d   :  { %325 = vmatmul.bf16.vlgmr.msra.gmra.mxu0 %v251_v33 }
 0x12e   :  { %v246_v34 = vpop.f32.mrf.mxu3 }
 0x1aa   :  { %v326_v38 = vpop.f32.mrf.mxu0 }
 0x1ab   :  { %v327_v39 = vadd.f32 %v326_v38, %v268_v37 }
 0x1ad   :  { %489 = vtanh.f32 %v327_v39 }
 0x1b2   :  { %v328_v40 = vpop.f32.mrf.mxu0 }
 0x1b3   :  { %v490_v41 = vpop.eup %489 }
 0x1b4   :  { %v331_v42 = vmul.f32 2.0, %v490_v41 }
 0x1b6   :  { %v332_v43 = vpack.c.bf16 %v331_v42, %v331_v42 }
 0x1b8   :  { %333 = vst [vmem:[#allocation7] sm:$0xf] %v332_v43 }
 0x1b9   :  { %344 = dma.vmem_to_hbm [thread:$0]  %s340_s1, 64, %s342_s23, [#allocation4]  }
 0x1ba   :  { %567 = dma.done.wait [#allocation4], 64  }
 0x1bb   :  { %568 = vsyncadd [#allocation4], 4294967232 }
 0x1bc   :  { %349 = vsyncpa [#allocation3], 1 }
 0x1bd   :  { %350 = vsyncpa [#allocation6], 1 }
 0x1be   :  { %351 = vsyncpa [#allocation4], 1 }

</bundles_post_ra>
